<compile_context>
chip_gen: v7x
topology: tpu7x:2x2x1
jax: 0.10.0
libtpu: 0.0.40
codegen_flags: <defaults>
</compile_context>

<pallas_src>
import math

import jax
import jax.numpy as jnp
from jax.experimental import pallas as pl
from jax.experimental.pallas import tpu as pltpu


_LANE = 128                            # TPU lane width
_MAX_LAST = 8192                       # cap on lane-dense last dim
_TARGET_BLOCK_BYTES = 4 * 1024 * 1024  # ~4 MiB per block (roofline-friendly)
_SMALL_ELEMS = 1 << 17                 # below this, launch overhead dominates


def _copy_kernel(x_ref, o_ref):
    # Identity copy of the current (tm, last) tile.
    o_ref[...] = x_ref[...]


def nn_squeeze(x: jax.Array, *, force_pallas: bool = False) -> jax.Array:
    """JAX/Pallas equivalent of `torch.squeeze(x)` (remove all size-1 dims)."""
    squeezed_shape = tuple(d for d in x.shape if d != 1)
    total = int(math.prod(x.shape)) if x.ndim else 1

    lane_ok = total > 0 and total % _LANE == 0
    big_enough = total >= _SMALL_ELEMS
    if not lane_ok or not (big_enough or force_pallas):
        # Fast path: squeeze is metadata-only -> no copy, no HBM traffic.
        return jnp.squeeze(x)

    # ---------------- Pallas tiled-copy path ----------------
    # Lane-dense 2-D view: last dim = largest power-of-two multiple of 128
    # (<= _MAX_LAST) that divides the total element count.
    last = _LANE
    while last * 2 <= _MAX_LAST and total % (last * 2) == 0:
        last *= 2
    lead = total // last

    itemsize = jnp.dtype(x.dtype).itemsize
    # Rows per block targeting ~4 MiB, rounded down to a multiple of 8
    # (sublane alignment), with a floor of 8 rows.
    rows = max(8, (_TARGET_BLOCK_BYTES // (last * itemsize)) // 8 * 8)
    tm = lead if lead <= rows else rows   # multiple of 8, or full extent

    x2d = x.reshape(lead, last)
    grid = (pl.cdiv(lead, tm),)

    out2d = pl.pallas_call(
        _copy_kernel,
        out_shape=jax.ShapeDtypeStruct((lead, last), x.dtype),
        grid=grid,
        in_specs=[pl.BlockSpec((tm, last), lambda i: (i, 0))],
        out_specs=pl.BlockSpec((tm, last), lambda i: (i, 0)),
        # Reuse the input HBM buffer for the output (identity copy).
        input_output_aliases={0: 0},
        compiler_params=pltpu.CompilerParams(
            # "parallel" lets v7x shard the copy across both TensorCores.
            dimension_semantics=("parallel",),
            vmem_limit_bytes=32 * 1024 * 1024,
        ),
        cost_estimate=pl.CostEstimate(
            flops=0,
            transcendentals=0,
            bytes_accessed=2 * total * itemsize,
        ),
    )(x2d)

    return out2d.reshape(squeezed_shape)


if __name__ == "__main__":
    key = jax.random.PRNGKey(0)
    k1, k2 = jax.random.split(key)

    # 1) Small input -> metadata-only fast path (no copy).
    x_small = jax.random.normal(k1, (2, 1, 16, 16), dtype=jnp.float32)
    exp_small = jnp.squeeze(x_small)
    out_small = jax.block_until_ready(nn_squeeze(x_small))
    assert out_small.shape == exp_small.shape == (2, 16, 16), out_small.shape
    assert out_small.dtype == x_small.dtype
    assert bool(jnp.all(out_small == exp_small))

    # 2) Lane-aligned input -> exercise the Pallas tiled-copy kernel.
    x_pallas = jax.random.normal(k2, (2, 1, 64, 128), dtype=jnp.float32)
    exp_pallas = jnp.squeeze(x_pallas)
    out_pallas = jax.block_until_ready(nn_squeeze(x_pallas, force_pallas=True))
    assert out_pallas.shape == exp_pallas.shape == (2, 64, 128), out_pallas.shape
    assert out_pallas.dtype == x_pallas.dtype
    assert bool(jnp.all(out_pallas == exp_pallas))

    # 3) Larger bf16 input (non-power-of-two lead) -> Pallas path w/ partial tile.
    x_big = jax.random.normal(key, (3, 1, 136, 256), dtype=jnp.bfloat16)
    exp_big = jnp.squeeze(x_big)
    out_big = jax.block_until_ready(nn_squeeze(x_big, force_pallas=True))
    assert out_big.shape == exp_big.shape == (3, 136, 256), out_big.shape
    assert out_big.dtype == x_big.dtype
    assert bool(jnp.all(out_big == exp_big))

    # 4) All-size-1 dims -> 0-d result (fast path).
    x_ones = jax.random.normal(key, (1, 1, 1), dtype=jnp.float32)
    out_ones = jax.block_until_ready(nn_squeeze(x_ones))
    assert out_ones.shape == ()
    assert bool(out_ones == jnp.squeeze(x_ones))

    print("KERNEL_OK")
</pallas_src>

<mosaic_0001>
module attributes {stable_mosaic.version = 11 : i64} {
  func.func @_copy_kernel(%arg0: i32, %arg1: memref<2x8192xf32, #tpu.memory_space<vmem>>, %arg2: memref<2x8192xf32, #tpu.memory_space<vmem>>) attributes {dimension_semantics = [#tpu.dimension_semantics<parallel>], iteration_bounds = array<i64: 1>, scalar_prefetch = 0 : i64, scratch_operands = 0 : i64, tpu.core_type = #tpu.core_type<tc>, window_params = [{transform_indices = @transform_0, window_bounds = array<i64: 2, 8192>}, {transform_indices = @transform_1, window_bounds = array<i64: 2, 8192>}]} {
    %c0 = arith.constant 0 : index
    %c0_0 = arith.constant 0 : index
    %0 = vector.load %arg1[%c0, %c0_0] : memref<2x8192xf32, #tpu.memory_space<vmem>>, vector<2x8192xf32>
    %c0_1 = arith.constant 0 : index
    %c0_2 = arith.constant 0 : index
    %1 = vector.load %arg2[%c0_1, %c0_2] : memref<2x8192xf32, #tpu.memory_space<vmem>>, vector<2x8192xf32>
    tpu.vector_store %arg2[%c0_1, %c0_2], %0 {strides = array<i32>} : memref<2x8192xf32, #tpu.memory_space<vmem>>, vector<2x8192xf32>,
    return
  }
  func.func @transform_0(%arg0: i32) -> (i32, i32) {
    %c0_i32 = arith.constant 0 : i32
    %c0_i32_0 = arith.constant 0 : i32
    return %arg0, %c0_i32 : i32, i32
  }
  func.func @transform_1(%arg0: i32) -> (i32, i32) {
    %c0_i32 = arith.constant 0 : i32
    %c0_i32_0 = arith.constant 0 : i32
    return %arg0, %c0_i32 : i32, i32
  }
}

</mosaic_0001>

<bundles_post_ra>
// kernel: tpu_custom_call.1
= control target key start
LH: loop header
LB: loop body
LE: loop exit
PB: predicated region body
PF: predicated region fallthrough
CT: control target
= control target key end

     0   :  { %6 = vsyncpa [#allocation3], 0  ;;  %s154_s0 = inlined_call_operand.hbm [shape: f32[2,8192], index: 0, kind: input, shape index: {}, may-alias: {0,1}]   ;;  %s155_s1 = inlined_call_operand.hbm [shape: f32[2,8192], index: 1, kind: output, shape index: {}, may-alias: {0,1}]  }
   0x1   :  { %7 = vsyncpa [#allocation4], 0  ;;  %s118_s6 = smov [#allocation2]   ;;  %s70_s10 = scalar_lea.hbm %s154_s0, 2048 }
   0x2   :  { %s14_s7 = sshll.u32 %s118_s6, 4  ;;  %p71_p0 = scmp.ne.s32.totalorder %s154_s0, %s70_s10  ;;  %s15_s7 = int_to_ptr.vmem [resolvable:$true] %s14_s7 }
   0x3   :  { %p74_p1 = scmp.lt.u32.totalorder %s70_s10, %s154_s0 }
   0x5   :  { %p76_p2 = pnand %p74_p1, %p71_p0 }
   0x7   :  { %79 = shalt.err (!%p76_p2)
}
   0x8   :  { %s80_s15 = scalar_lea.vmem %s15_s7, 2048  ;;  %p85_p4 = scmp.lt.s32.totalorder %s15_s7, %s15_s7 }
   0x9   :  { %p81_p3 = scmp.ne.s32.totalorder %s15_s7, %s80_s15  ;;  %p86_p5 = scmp.lt.s32.totalorder %s80_s15, %s80_s15 }
   0xb   :  { %p87_p6 = por %p86_p5, %p85_p4 }
   0xd   :  { %p88_p7 = pnand %p87_p6, %p81_p3 }
   0xf   :  { %91 = shalt.err (!%p88_p7)
}
  0x10   :  { %17 = dma.hbm_to_vmem [thread:$0]  %s154_s0, 2048, %s15_s7, [#allocation3]  }
  0x11   :  { %114 = dma.done.wait [#allocation3], 2048  }
  0x12   :  { %115 = vsyncadd [#allocation3], 4294965248  ;;  %v21_v0 = vld [vmem:[#allocation2] sm:$0xff]  ;;  %v22_v1 = vld [vmem:[#allocation2 + $0x8] sm:$0xff]  ;;  %s119_s18 = smov [#allocation5]  }
  0x13   :  { %v23_v2 = vld [vmem:[#allocation2 + $0x10] sm:$0xff]  ;;  %37 = vst [vmem:[#allocation5] sm:$0xff] %v21_v0  ;;  %38 = vst [vmem:[#allocation5 + $0x8] sm:$0xff] %v22_v1  ;;  %v24_v3 = vld [vmem:[#allocation2 + $0x18] sm:$0xff]  ;;  %s59_s19 = sshll.u32 %s119_s18, 4  ;;  %s60_s19 = int_to_ptr.vmem [resolvable:$true] %s59_s19 }
  0x14   :  { %39 = vst [vmem:[#allocation5 + $0x10] sm:$0xff] %v23_v2  ;;  %v25_v4 = vld [vmem:[#allocation2 + $0x20] sm:$0xff]  ;;  %v26_v5 = vld [vmem:[#allocation2 + $0x28] sm:$0xff]  ;;  %40 = vst [vmem:[#allocation5 + $0x18] sm:$0xff] %v24_v3  ;;  %s92_s0 = scalar_lea.vmem %s60_s19, 2048  ;;  %p97_p9 = scmp.lt.s32.totalorder %s60_s19, %s60_s19 }
  0x15   :  { %41 = vst [vmem:[#allocation5 + $0x20] sm:$0xff] %v25_v4  ;;  %42 = vst [vmem:[#allocation5 + $0x28] sm:$0xff] %v26_v5  ;;  %v27_v6 = vld [vmem:[#allocation2 + $0x30] sm:$0xff]  ;;  %v28_v7 = vld [vmem:[#allocation2 + $0x38] sm:$0xff]  ;;  %p93_p8 = scmp.ne.s32.totalorder %s60_s19, %s92_s0  ;;  %p98_p10 = scmp.lt.s32.totalorder %s92_s0, %s92_s0 }
  0x16   :  { %v29_v8 = vld [vmem:[#allocation2 + $0x40] sm:$0xff]  ;;  %43 = vst [vmem:[#allocation5 + $0x30] sm:$0xff] %v27_v6  ;;  %44 = vst [vmem:[#allocation5 + $0x38] sm:$0xff] %v28_v7  ;;  %v30_v9 = vld [vmem:[#allocation2 + $0x48] sm:$0xff] }
  0x17   :  { %45 = vst [vmem:[#allocation5 + $0x40] sm:$0xff] %v29_v8  ;;  %v31_v10 = vld [vmem:[#allocation2 + $0x50] sm:$0xff]  ;;  %v32_v11 = vld [vmem:[#allocation2 + $0x58] sm:$0xff]  ;;  %46 = vst [vmem:[#allocation5 + $0x48] sm:$0xff] %v30_v9  ;;  %p99_p11 = por %p98_p10, %p97_p9 }
  0x18   :  { %47 = vst [vmem:[#allocation5 + $0x50] sm:$0xff] %v31_v10  ;;  %48 = vst [vmem:[#allocation5 + $0x58] sm:$0xff] %v32_v11  ;;  %v33_v12 = vld [vmem:[#allocation2 + $0x60] sm:$0xff]  ;;  %v34_v13 = vld [vmem:[#allocation2 + $0x68] sm:$0xff] }
  0x19   :  { %v35_v14 = vld [vmem:[#allocation2 + $0x70] sm:$0xff]  ;;  %49 = vst [vmem:[#allocation5 + $0x60] sm:$0xff] %v33_v12  ;;  %50 = vst [vmem:[#allocation5 + $0x68] sm:$0xff] %v34_v13  ;;  %v36_v15 = vld [vmem:[#allocation2 + $0x78] sm:$0xff]  ;;  %p100_p12 = pnand %p99_p11, %p93_p8 }
  0x1a   :  { %51 = vst [vmem:[#allocation5 + $0x70] sm:$0xff] %v35_v14  ;;  %52 = vst [vmem:[#allocation5 + $0x78] sm:$0xff] %v36_v15 }
  0x1b   :  { %103 = shalt.err (!%p100_p12)
}
  0x1c   :  { %s104_s22 = scalar_lea.hbm %s155_s1, 2048 }
  0x1d   :  { %p105_p13 = scmp.ne.s32.totalorder %s155_s1, %s104_s22  ;;  %p108_p0 = scmp.lt.u32.totalorder %s104_s22, %s155_s1 }
  0x1f   :  { %p110_p1 = pnand %p108_p0, %p105_p13 }
  0x21   :  { %113 = shalt.err (!%p110_p1)
}
  0x22   :  { %62 = dma.vmem_to_hbm [thread:$0]  %s60_s19, 2048, %s155_s1, [#allocation4]  }
  0x23   :  { %116 = dma.done.wait [#allocation4], 2048  }
  0x24   :  { %117 = vsyncadd [#allocation4], 4294965248 }
  0x25   :  { %66 = vsyncpa [#allocation3], 1 }
  0x26   :  { %67 = vsyncpa [#allocation4], 1 }

</bundles_post_ra>
